<compile_context>
chip_gen: v6e
topology: v6e:2x2x1
jax: 0.10.0
libtpu: 0.0.40
codegen_flags: <defaults>
</compile_context>

<pallas_src>
import functools

import jax
import jax.numpy as jnp
from jax import lax
from jax.experimental import pallas as pl
from jax.experimental.pallas import tpu as pltpu


def _se_kernel(x_ref, w1t_ref, w2_ref, o_ref, *, inv_hw):
    # x_ref  : (Bt, C, HW)  batch tile, spatial dims flattened (HW on lanes).
    # w1t_ref: (C, Cr)      first Linear weight, pre-transposed to (in, out).
    # w2_ref : (C, Cr)      second Linear weight in PyTorch (out, in) layout.
    x = x_ref[...]                                                       # input dtype

    # --- Squeeze: AdaptiveAvgPool2d(1) ---------------------------------------
    # Lane reduction over HW with an f32 accumulator (no full f32 copy of x);
    # keepdims keeps C on sublanes so the final broadcast needs no relayout.
    y = jnp.sum(x, axis=-1, keepdims=True, dtype=jnp.float32) * inv_hw   # (Bt, C, 1)

    # --- Excitation MLP (tiny: C=32, Cr=2 -> keep off the MXU) ---------------
    w1t = w1t_ref[...].astype(jnp.float32)                               # (C, Cr)
    w2 = w2_ref[...].astype(jnp.float32)                                 # (C, Cr)
    # h[b, j] = relu( sum_c y[b, c] * w1[j, c] )         (sublane reduce over C)
    h = jnp.maximum(jnp.sum(y * w1t[None, :, :], axis=1, keepdims=True), 0.0)  # (Bt, 1, Cr)
    # s[b, c] = sigmoid( sum_j h[b, j] * w2[c, j] )      (lane reduce over Cr)
    s = jax.nn.sigmoid(jnp.sum(h * w2[None, :, :], axis=-1, keepdims=True))    # (Bt, C, 1)
    # TODO(synk): for large-C SE blocks (C >= 256, Cr >= 16) compute h/s with
    # jnp.dot(..., preferred_element_type=jnp.float32) on the MXU instead.

    # --- Scale: x * y.expand_as(x)  (input dtype, lane-broadcast store) ------
    o_ref[...] = x * s.astype(x.dtype)


def _tpu_budgets():
    """Returns (vmem_limit_bytes, x_buffer_budget_bytes, num_tensorcores)."""
    vmem_cap = 64 * 1024 * 1024   # conservative default (v7x-sized)
    num_cores = 1
    try:
        info = pltpu.get_tpu_info()
        vmem_cap = int(getattr(info, "vmem_capacity_bytes", vmem_cap))
        for name in ("num_cores", "core_count", "num_tensorcores", "tensorcore_count"):
            val = getattr(info, name, None)
            if isinstance(val, int) and val > 0:
                num_cores = val
                break
    except Exception:
        pass
    # 128-MiB chips (v5e/v6e): 64 MiB scoped limit, 32 MiB for the 4 x-buffers.
    #  64-MiB chip  (v7x):     48 MiB scoped limit, 24 MiB for the 4 x-buffers.
    vmem_limit = min(64 * 1024 * 1024, (vmem_cap * 3) // 4)
    budget = vmem_limit // 2
    return vmem_limit, budget, max(1, num_cores)


def se_layer(x, w1, w2):
    """SELayer forward.  x: (B, C, H, W); w1: (C//r, C); w2: (C, C//r) (nn.Linear layout)."""
    B, C, H, W = x.shape
    HW = H * W
    Cr = w1.shape[0]
    assert w1.shape == (Cr, C) and w2.shape == (C, Cr)

    # No pad / slice: full-extent last-dim block, one HBM pass in + one out.
    x3 = x.reshape(B, C, HW)
    w1t = w1.T  # tiny (C, Cr) transpose done once in XLA; no in-kernel vxpose.

    vmem_limit, budget_bytes, num_cores = _tpu_budgets()

    # VMEM accounting uses the physically padded tile footprint (lanes -> 128,
    # sublanes -> 8); 4 x-sized buffers are live at once (in+out, double-buffered).
    itemsize = jnp.dtype(x.dtype).itemsize
    hw_pad = -(-HW // 128) * 128
    c_pad = -(-C // 8) * 8
    per_image_bytes = c_pad * hw_pad * itemsize
    Bt = max(1, min(B, budget_bytes // (4 * per_image_bytes)))

    if num_cores >= 2 and B > 1:
        # Multi-TensorCore chips: aim for several pipelined steps per core so the
        # per-core DMA/compute pipeline overlaps and the split is balanced.
        desired_steps = min(B, 4 * num_cores)
        Bt = min(Bt, max(1, B // desired_steps))
    grid_b = -(-B // Bt)

    cost = pl.CostEstimate(
        flops=B * (2 * C * HW + 4 * C * Cr),
        transcendentals=B * C,
        bytes_accessed=2 * B * C * HW * itemsize
        + 2 * C * Cr * jnp.dtype(w1.dtype).itemsize,
    )

    kernel = functools.partial(_se_kernel, inv_hw=1.0 / HW)

    out = pl.pallas_call(
        kernel,
        out_shape=jax.ShapeDtypeStruct((B, C, HW), x.dtype),
        grid_spec=pl.GridSpec(
            grid=(grid_b,),
            in_specs=[
                pl.BlockSpec((Bt, C, HW), lambda b: (b, 0, 0)),
                pl.BlockSpec((C, Cr), lambda b: (0, 0)),
                pl.BlockSpec((C, Cr), lambda b: (0, 0)),
            ],
            out_specs=pl.BlockSpec((Bt, C, HW), lambda b: (b, 0, 0)),
        ),
        compiler_params=pltpu.CompilerParams(
            dimension_semantics=("parallel",),
            vmem_limit_bytes=vmem_limit,
        ),
        cost_estimate=cost,
    )(x3, w1t, w2)

    return out.reshape(B, C, H, W)


def se_layer_ref(x, w1, w2):
    """Pure-JAX reference matching the PyTorch forward."""
    y = jnp.mean(x.astype(jnp.float32), axis=(2, 3))                          # (B, C)
    h = jnp.maximum(
        jnp.einsum("bc,jc->bj", y, w1.astype(jnp.float32),
                   precision=lax.Precision.HIGHEST), 0.0)                     # (B, Cr)
    s = jax.nn.sigmoid(
        jnp.einsum("bj,cj->bc", h, w2.astype(jnp.float32),
                   precision=lax.Precision.HIGHEST))                          # (B, C)
    return (x * s[:, :, None, None].astype(x.dtype)).astype(x.dtype)


if __name__ == "__main__":
    key = jax.random.PRNGKey(0)
    kx, k1, k2, kx2 = jax.random.split(key, 4)

    # Module config: channel=32, reduction=16 -> hidden = 2
    C, reduction = 32, 16
    Cr = C // reduction
    # nn.Linear weight shapes: (out_features, in_features), bias=False
    w1 = jax.random.normal(k1, (Cr, C), dtype=jnp.float32) * 0.1
    w2 = jax.random.normal(k2, (C, Cr), dtype=jnp.float32) * 0.1

    # Case 1: lane-dense spatial extent (16*16 = 256 = two full vregs per row).
    x_a = jax.random.normal(kx, (2, C, 16, 16), dtype=jnp.float32)
    # Case 2: HW not a multiple of 128 (7*7 = 49) -> masked tail-vreg path.
    x_b = jax.random.normal(kx2, (3, C, 7, 7), dtype=jnp.float32)

    for x in (x_a, x_b):
        out = jax.block_until_ready(se_layer(x, w1, w2))
        ref = se_layer_ref(x, w1, w2)
        assert out.shape == x.shape
        assert jnp.allclose(out, ref, atol=1e-4, rtol=1e-4), (
            f"mismatch vs reference for shape {x.shape}")

    print("KERNEL_OK")
</pallas_src>

<mosaic_0001>
module attributes {stable_mosaic.version = 11 : i64} {
  func.func @_se_kernel(%arg0: i32, %arg1: memref<2x32x256xf32, #tpu.memory_space<vmem>>, %arg2: memref<32x2xf32, #tpu.memory_space<vmem>>, %arg3: memref<32x2xf32, #tpu.memory_space<vmem>>, %arg4: memref<2x32x256xf32, #tpu.memory_space<vmem>>) attributes {dimension_semantics = [#tpu.dimension_semantics<parallel>], iteration_bounds = array<i64: 1>, scalar_prefetch = 0 : i64, scratch_operands = 0 : i64, tpu.core_type = #tpu.core_type<tc>, window_params = [{transform_indices = @transform_0, window_bounds = array<i64: 2, 32, 256>}, {pipeline_mode = #tpu.pipeline_mode<synchronous>, transform_indices = @transform_1, window_bounds = array<i64: 32, 2>}, {pipeline_mode = #tpu.pipeline_mode<synchronous>, transform_indices = @transform_2, window_bounds = array<i64: 32, 2>}, {transform_indices = @transform_3, window_bounds = array<i64: 2, 32, 256>}]} {
    %c0 = arith.constant 0 : index
    %c0_0 = arith.constant 0 : index
    %c0_1 = arith.constant 0 : index
    %0 = vector.load %arg1[%c0, %c0_0, %c0_1] : memref<2x32x256xf32, #tpu.memory_space<vmem>>, vector<2x32x256xf32>
    %cst = arith.constant dense<0.000000e+00> : vector<2x32xf32>
    %1 = vector.multi_reduction <add>, %0, %cst [2] : vector<2x32x256xf32> to vector<2x32xf32>
    %2 = vector.shape_cast %1 : vector<2x32xf32> to vector<2x32x1xf32>
    %cst_2 = arith.constant 3.906250e-03 : f32
    %3 = vector.broadcast %cst_2 : f32 to vector<2x32x1xf32>
    %4 = arith.mulf %2, %3 : vector<2x32x1xf32>
    %c0_3 = arith.constant 0 : index
    %c0_4 = arith.constant 0 : index
    %5 = vector.load %arg2[%c0_3, %c0_4] : memref<32x2xf32, #tpu.memory_space<vmem>>, vector<32x2xf32>
    %c0_5 = arith.constant 0 : index
    %c0_6 = arith.constant 0 : index
    %6 = vector.load %arg3[%c0_5, %c0_6] : memref<32x2xf32, #tpu.memory_space<vmem>>, vector<32x2xf32>
    %7 = vector.shape_cast %5 : vector<32x2xf32> to vector<1x32x2xf32>
    %8 = vector.broadcast %4 : vector<2x32x1xf32> to vector<2x32x2xf32>
    %9 = vector.broadcast %7 : vector<1x32x2xf32> to vector<2x32x2xf32>
    %10 = arith.mulf %8, %9 : vector<2x32x2xf32>
    %cst_7 = arith.constant dense<0.000000e+00> : vector<2x2xf32>
    %11 = vector.multi_reduction <add>, %10, %cst_7 [1] : vector<2x32x2xf32> to vector<2x2xf32>
    %12 = vector.shape_cast %11 : vector<2x2xf32> to vector<2x1x2xf32>
    %cst_8 = arith.constant 0.000000e+00 : f32
    %13 = vector.broadcast %cst_8 : f32 to vector<2x1x2xf32>
    %14 = arith.maximumf %12, %13 : vector<2x1x2xf32>
    %15 = vector.shape_cast %6 : vector<32x2xf32> to vector<1x32x2xf32>
    %16 = vector.broadcast %14 : vector<2x1x2xf32> to vector<2x32x2xf32>
    %17 = vector.broadcast %15 : vector<1x32x2xf32> to vector<2x32x2xf32>
    %18 = arith.mulf %16, %17 : vector<2x32x2xf32>
    %cst_9 = arith.constant dense<0.000000e+00> : vector<2x32xf32>
    %19 = vector.multi_reduction <add>, %18, %cst_9 [2] : vector<2x32x2xf32> to vector<2x32xf32>
    %20 = vector.shape_cast %19 : vector<2x32xf32> to vector<2x32x1xf32>
    %21 = arith.negf %20 : vector<2x32x1xf32>
    %22 = math.exp %21 : vector<2x32x1xf32>
    %cst_10 = arith.constant 1.000000e+00 : f32
    %23 = vector.broadcast %cst_10 : f32 to vector<2x32x1xf32>
    %24 = arith.addf %23, %22 : vector<2x32x1xf32>
    %25 = arith.divf %23, %24 : vector<2x32x1xf32>
    %26 = vector.broadcast %25 : vector<2x32x1xf32> to vector<2x32x256xf32>
    %27 = arith.mulf %0, %26 : vector<2x32x256xf32>
    %c0_11 = arith.constant 0 : index
    %c0_12 = arith.constant 0 : index
    %c0_13 = arith.constant 0 : index
    %28 = vector.load %arg4[%c0_11, %c0_12, %c0_13] : memref<2x32x256xf32, #tpu.memory_space<vmem>>, vector<2x32x256xf32>
    tpu.vector_store %arg4[%c0_11, %c0_12, %c0_13], %27 {strides = array<i32>} : memref<2x32x256xf32, #tpu.memory_space<vmem>>, vector<2x32x256xf32>,
    return
  }
  func.func @transform_0(%arg0: i32) -> (i32, i32, i32) {
    %c0_i32 = arith.constant 0 : i32
    %c0_i32_0 = arith.constant 0 : i32
    %c0_i32_1 = arith.constant 0 : i32
    return %arg0, %c0_i32, %c0_i32_0 : i32, i32, i32
  }
  func.func @transform_1(%arg0: i32) -> (i32, i32) {
    %c0_i32 = arith.constant 0 : i32
    %c0_i32_0 = arith.constant 0 : i32
    %c0_i32_1 = arith.constant 0 : i32
    return %c0_i32, %c0_i32_0 : i32, i32
  }
  func.func @transform_2(%arg0: i32) -> (i32, i32) {
    %c0_i32 = arith.constant 0 : i32
    %c0_i32_0 = arith.constant 0 : i32
    %c0_i32_1 = arith.constant 0 : i32
    return %c0_i32, %c0_i32_0 : i32, i32
  }
  func.func @transform_3(%arg0: i32) -> (i32, i32, i32) {
    %c0_i32 = arith.constant 0 : i32
    %c0_i32_0 = arith.constant 0 : i32
    %c0_i32_1 = arith.constant 0 : i32
    return %arg0, %c0_i32, %c0_i32_0 : i32, i32, i32
  }
}

</mosaic_0001>

<bundles_post_ra>
// kernel: tpu_custom_call.1
= control target key start
LH: loop header
LB: loop body
LE: loop exit
PB: predicated region body
PF: predicated region fallthrough
CT: control target
= control target key end

     0   :  { %8 = vsyncpa [#allocation3], 0  ;;  %s479_s0 = inlined_call_operand.hbm [shape: f32[2,32,256], index: 0, kind: input, shape index: {}]   ;;  %s480_s1 = inlined_call_operand.vmem [shape: f32[32,2], index: 1, kind: input, shape index: {}]   ;;  %s481_s2 = inlined_call_operand.vmem [shape: f32[32,2], index: 2, kind: input, shape index: {}]   ;;  %s482_s3 = inlined_call_operand.hbm [shape: f32[2,32,256], index: 3, kind: output, shape index: {}]  }
   0x1   :  { %9 = vsyncpa [#allocation4], 0  ;;  %s339_s12 = smov [#allocation2]  }
   0x2   :  { %s15_s13 = sshll.u32 %s339_s12, 4  ;;  %s16_s13 = int_to_ptr.vmem [resolvable:$true] %s15_s13 }
   0x3   :  { %s303_s14 = scalar_lea.vmem %s16_s13, 2048  ;;  %p308_p1 = scmp.lt.s32.totalorder %s16_s13, %s16_s13 }
   0x4   :  { %p304_p0 = scmp.ne.s32.totalorder %s16_s13, %s303_s14  ;;  %p309_p2 = scmp.lt.s32.totalorder %s303_s14, %s303_s14 }
   0x6   :  { %p310_p3 = por %p309_p2, %p308_p1 }
   0x8   :  { %p311_p4 = pnand %p310_p3, %p304_p0 }
   0xa   :  { %314 = shalt.err (!%p311_p4)
}
   0xb   :  { %s340_s15 = smov 256   ;;  %s341_s16 = smov 16  }
   0xc   :  { %21 = dma.hbm_to_vmem [thread:$0]  %s479_s0, 2048, %s16_s13, [#allocation3], %s340_s15, %s340_s15, %s341_s16  }
   0xd   :  { %335 = dma.done.wait [#allocation3], 2048  }
   0xe   :  { %336 = vsyncadd [#allocation3], 4294965248  ;;  %v369_v0 = vld [vmem:[#allocation2 + $0x40] sm:$0xff]  ;;  %v371_v1 = vld [vmem:[#allocation2 + $0x48] sm:$0xff]  ;;  %vm93_vm0 = vcmask 15360  }
   0xf   :  { %v373_v2 = vld [vmem:[#allocation2] sm:$0xff]  ;;  %v57_v3 = vadd.f32 %v371_v1, %v369_v0  ;;  %v377_v4 = vld [vmem:[#allocation2 + $0x8] sm:$0xff]  ;;  %v379_v5 = vld [vmem:[#allocation2 + $0x50] sm:$0xff] }
  0x10   :  { %v381_v6 = vld [vmem:[#allocation2 + $0x58] sm:$0xff]  ;;  %v45_v7 = vadd.f32 %v377_v4, %v373_v2  ;;  %v385_v8 = vld [vmem:[#allocation2 + $0x10] sm:$0xff]  ;;  %v393_v12 = vld [vmem:[#allocation2 + $0x60] sm:$0xff] }
  0x11   :  { %v387_v9 = vld [vmem:[#allocation2 + $0x18] sm:$0xff]  ;;  %58 = vadd.xlane.f32.xlu1 %v57_v3  ;;  %v60_v10 = vadd.f32 %v381_v6, %v379_v5  ;;  %v395_v13 = vld [vmem:[#allocation2 + $0x68] sm:$0xff]  ;;  %v397_v14 = vld [vmem:[#allocation2 + $0x20] sm:$0xff] }
  0x12   :  { %46 = vadd.xlane.f32.xlu0 %v45_v7  ;;  %v48_v11 = vadd.f32 %v387_v9, %v385_v8  ;;  %v399_v15 = vld [vmem:[#allocation2 + $0x28] sm:$0xff]  ;;  %v63_v16 = vadd.f32 %v395_v13, %v393_v12  ;;  %v405_v18 = vld [vmem:[#allocation2 + $0x70] sm:$0xff]  ;;  %v407_v19 = vld [vmem:[#allocation2 + $0x78] sm:$0xff] }
  0x13   :  { %v51_v17 = vadd.f32 %v399_v15, %v397_v14  ;;  %v409_v20 = vld [vmem:[#allocation2 + $0x30] sm:$0xff]  ;;  %v411_v21 = vld [vmem:[#allocation2 + $0x38] sm:$0xff]  ;;  %v66_v22 = vadd.f32 %v407_v19, %v405_v18  ;;  %v77_v27 = vld [vmem:[%s480_s1] sm:$0xff] }
  0x14   :  { %v54_v23 = vadd.f32 %v411_v21, %v409_v20  ;;  %v78_v30 = vld [vmem:[%s480_s1 + $0x8] sm:$0xff]  ;;  %v79_v40 = vld [vmem:[%s480_s1 + $0x10] sm:$0xff]  ;;  %v80_v49 = vld [vmem:[%s480_s1 + $0x18] sm:$0xff] }
  0x15   :  { %61 = vadd.xlane.f32.xlu1 %v60_v10 }
  0x16   :  { %49 = vadd.xlane.f32.xlu0 %v48_v11 }
  0x19   :  { %64 = vadd.xlane.f32.xlu1 %v63_v16 }
  0x1a   :  { %52 = vadd.xlane.f32.xlu0 %v51_v17 }
  0x1d   :  { %67 = vadd.xlane.f32.xlu1 %v66_v22 }
  0x1e   :  { %55 = vadd.xlane.f32.xlu0 %v54_v23 }
  0x9a   :  { %v59_v24 = vpop.xlane.xlu1 %58 }
  0x9b   :  { %v73_v25 = vmul.f32 0.00390625, %v59_v24  ;;  %v47_v26 = vpop.xlane.xlu0 %46 }
  0x9c   :  { %v69_v33 = vmul.f32 0.00390625, %v47_v26 }
  0x9d   :  { %v89_v28 = vmul.f32 %v77_v27, %v73_v25 }
  0x9e   :  { %v62_v29 = vpop.xlane.xlu1 %61  ;;  %v85_v43 = vmul.f32 %v77_v27, %v69_v33  ;;  %v84_v33 = vld [vmem:[%s481_s2 + $0x18] sm:$0xff] }
  0x9f   :  { %v74_v31 = vmul.f32 0.00390625, %v62_v29  ;;  %v50_v32 = vpop.xlane.xlu0 %49  ;;  %v107_v35 = vsel %vm93_vm0, %v89_v28, 0.0  ;;  %v82_v29 = vld [vmem:[%s481_s2 + $0x8] sm:$0xff] }
  0xa0   :  { %v70_v34 = vmul.f32 0.00390625, %v50_v32  ;;  %v94_v54 = vsel %vm93_vm0, %v85_v43, 0.0 }
  0xa1   :  { %v90_v36 = vmul.f32 %v78_v30, %v74_v31 }
  0xa2   :  { %v86_v37 = vmul.f32 %v78_v30, %v70_v34  ;;  %v65_v38 = vpop.xlane.xlu1 %64  ;;  %v81_v30 = vld [vmem:[%s481_s2] sm:$0xff]  ;;  %v83_v34 = vld [vmem:[%s481_s2 + $0x10] sm:$0xff]  ;;  %s342_s2 = smov [#allocation5]  }
  0xa3   :  { %v108_v39 = vsel %vm93_vm0, %v90_v36, 0.0  ;;  %v75_v41 = vmul.f32 0.00390625, %v65_v38  ;;  %v53_v42 = vpop.xlane.xlu0 %52  ;;  %s239_s6 = sshll.u32 %s342_s2, 4  ;;  %s240_s6 = int_to_ptr.vmem [resolvable:$true] %s239_s6 }
  0xa4   :  { %v109_v44 = vadd.f32 %v108_v39, %v107_v35  ;;  %v71_v45 = vmul.f32 0.00390625, %v53_v42  ;;  %v95_v47 = vsel %vm93_vm0, %v86_v37, 0.0  ;;  %s315_s7 = scalar_lea.vmem %s240_s6, 2048  ;;  %p320_p6 = scmp.lt.s32.totalorder %s240_s6, %s240_s6 }
  0xa5   :  { %v91_v46 = vmul.f32 %v79_v40, %v75_v41  ;;  %v96_v58 = vadd.f32 %v95_v47, %v94_v54  ;;  %p316_p5 = scmp.ne.s32.totalorder %s240_s6, %s315_s7  ;;  %p321_p7 = scmp.lt.s32.totalorder %s315_s7, %s315_s7 }
  0xa6   :  { %v87_v48 = vmul.f32 %v79_v40, %v71_v45  ;;  %v68_v50 = vpop.xlane.xlu1 %67 }
  0xa7   :  { %v110_v51 = vsel %vm93_vm0, %v91_v46, 0.0  ;;  %v76_v52 = vmul.f32 0.00390625, %v68_v50  ;;  %v56_v53 = vpop.xlane.xlu0 %55  ;;  %p322_p8 = por %p321_p7, %p320_p6 }
  0xa8   :  { %v111_v55 = vadd.f32 %v110_v51, %v109_v44  ;;  %v97_v56 = vsel %vm93_vm0, %v87_v48, 0.0  ;;  %v72_v57 = vmul.f32 0.00390625, %v56_v53 }
  0xa9   :  { %v92_v59 = vmul.f32 %v80_v49, %v76_v52  ;;  %v98_v61 = vadd.f32 %v97_v56, %v96_v58  ;;  %p323_p9 = pnand %p322_p8, %p316_p5 }
  0xaa   :  { %v88_v60 = vmul.f32 %v80_v49, %v72_v57 }
  0xab   :  { %v112_v62 = vsel %vm93_vm0, %v92_v59, 0.0 }
  0xac   :  { %v113_v63 = vadd.f32 %v112_v62, %v111_v55  ;;  %v99_v3 = vsel %vm93_vm0, %v88_v60, 0.0 }
  0xad   :  { %v100_v7 = vadd.f32 %v99_v3, %v98_v61 }
  0xae   :  { %v114_v10 = vrot.slane %v113_v63, 4 }
  0xaf   :  { %v101_v11 = vrot.slane %v100_v7, 4 }
  0xb0   :  { %v115_v16 = vadd.f32 %v114_v10, %v113_v63 }
  0xb1   :  { %v102_v17 = vadd.f32 %v101_v11, %v100_v7 }
  0xb2   :  { %v116_v22 = vrot.slane %v115_v16, 2 }
  0xb3   :  { %v103_v23 = vrot.slane %v102_v17, 2 }
  0xb4   :  { %v117_v24 = vadd.f32 %v116_v22, %v115_v16 }
  0xb5   :  { %v104_v25 = vadd.f32 %v103_v23, %v102_v17 }
  0xb6   :  { %v118_v26 = vrot.slane %v117_v24, 1 }
  0xb7   :  { %v105_v27 = vrot.slane %v104_v25, 1 }
  0xb8   :  { %v119_v31 = vadd.f32 %v118_v26, %v117_v24 }
  0xb9   :  { %v106_v28 = vadd.f32 %v105_v27, %v104_v25 }
  0xba   :  { %v121_v37 = vmax.f32 %v119_v31, 0.0 }
  0xbb   :  { %v120_v32 = vmax.f32 %v106_v28, 0.0 }
  0xbc   :  { %v127_v44 = vmul.f32 %v121_v37, %v82_v29  ;;  %v126_v45 = vmul.f32 %v121_v37, %v81_v30  ;;  %v129_v48 = vmul.f32 %v121_v37, %v84_v33  ;;  %v128_v49 = vmul.f32 %v121_v37, %v83_v34 }
  0xbd   :  { %v123_v35 = vmul.f32 %v120_v32, %v82_v29  ;;  %v122_v36 = vmul.f32 %v120_v32, %v81_v30  ;;  %v125_v40 = vmul.f32 %v120_v32, %v84_v33  ;;  %v124_v41 = vmul.f32 %v120_v32, %v83_v34 }
  0xbe   :  { %v145_v46 = vsel %vm93_vm0, %v127_v44, 0.0  ;;  %v142_v47 = vsel %vm93_vm0, %v126_v45, 0.0  ;;  %v151_v50 = vsel %vm93_vm0, %v129_v48, 0.0  ;;  %v148_v51 = vsel %vm93_vm0, %v128_v49, 0.0 }
  0xbf   :  { %v133_v38 = vsel %vm93_vm0, %v123_v35, 0.0  ;;  %v130_v39 = vsel %vm93_vm0, %v122_v36, 0.0  ;;  %v139_v42 = vsel %vm93_vm0, %v125_v40, 0.0  ;;  %v136_v43 = vsel %vm93_vm0, %v124_v41, 0.0 }
  0xc0   :  { %134 = vadd.xlane.f32.xlu1 %v133_v38  ;;  %131 = vadd.xlane.f32.xlu0 %v130_v39 }
  0xc4   :  { %140 = vadd.xlane.f32.xlu1 %v139_v42  ;;  %137 = vadd.xlane.f32.xlu0 %v136_v43 }
  0xc8   :  { %146 = vadd.xlane.f32.xlu1 %v145_v46  ;;  %143 = vadd.xlane.f32.xlu0 %v142_v47 }
  0xcc   :  { %152 = vadd.xlane.f32.xlu1 %v151_v50  ;;  %149 = vadd.xlane.f32.xlu0 %v148_v51 }
 0x149   :  { %v135_v52 = vpop.xlane.xlu1 %134  ;;  %v132_v53 = vpop.xlane.xlu0 %131 }
 0x14a   :  { %v252_v54 = vmul.f32 -1.442695, %v135_v52  ;;  %v251_v55 = vmul.f32 -1.442695, %v132_v53 }
 0x14c   :  { %263 = vpow2.f32 %v252_v54 }
 0x14d   :  { %265 = vpow2.f32 %v251_v55  ;;  %v141_v56 = vpop.xlane.xlu1 %140  ;;  %v138_v57 = vpop.xlane.xlu0 %137 }
 0x14e   :  { %v254_v58 = vmul.f32 -1.442695, %v141_v56  ;;  %v253_v59 = vmul.f32 -1.442695, %v138_v57 }
 0x150   :  { %267 = vpow2.f32 %v254_v58 }
 0x151   :  { %269 = vpow2.f32 %v253_v59  ;;  %v147_v60 = vpop.xlane.xlu1 %146  ;;  %v144_v61 = vpop.xlane.xlu0 %143 }
 0x152   :  { %v256_v62 = vmul.f32 -1.442695, %v147_v60  ;;  %v255_v63 = vmul.f32 -1.442695, %v144_v61 }
 0x154   :  { %271 = vpow2.f32 %v256_v62 }
 0x155   :  { %273 = vpow2.f32 %v255_v63  ;;  %v153_v3 = vpop.xlane.xlu1 %152  ;;  %v150_v7 = vpop.xlane.xlu0 %149 }
 0x156   :  { %v258_v10 = vmul.f32 -1.442695, %v153_v3  ;;  %v257_v11 = vmul.f32 -1.442695, %v150_v7 }
 0x158   :  { %275 = vpow2.f32 %v258_v10 }
 0x159   :  { %v264_v16 = vpop.eup %263  ;;  %277 = vpow2.f32 %v257_v11 }
 0x15a   :  { %v266_v17 = vpop.eup %265  ;;  %v179_v22 = vadd.f32 1.0, %v264_v16 }
 0x15b   :  { %v178_v23 = vadd.f32 1.0, %v266_v17 }
 0x15c   :  { %279 = vrcp.f32 %v179_v22 }
 0x15d   :  { %v268_v24 = vpop.eup %267  ;;  %281 = vrcp.f32 %v178_v23 }
 0x15e   :  { %v270_v25 = vpop.eup %269  ;;  %v181_v26 = vadd.f32 1.0, %v268_v24 }
 0x15f   :  { %v180_v27 = vadd.f32 1.0, %v270_v25 }
 0x160   :  { %283 = vrcp.f32 %v181_v26 }
 0x161   :  { %v272_v28 = vpop.eup %271  ;;  %285 = vrcp.f32 %v180_v27 }
 0x162   :  { %v274_v29 = vpop.eup %273  ;;  %v183_v30 = vadd.f32 1.0, %v272_v28 }
 0x163   :  { %v182_v31 = vadd.f32 1.0, %v274_v29 }
 0x164   :  { %287 = vrcp.f32 %v183_v30 }
 0x165   :  { %v276_v32 = vpop.eup %275  ;;  %289 = vrcp.f32 %v182_v31 }
 0x166   :  { %v278_v33 = vpop.eup %277  ;;  %v185_v34 = vadd.f32 1.0, %v276_v32 }
 0x167   :  { %v184_v35 = vadd.f32 1.0, %v278_v33 }
 0x168   :  { %291 = vrcp.f32 %v185_v34 }
 0x169   :  { %v280_v36 = vpop.eup %279  ;;  %293 = vrcp.f32 %v184_v35 }
 0x16a   :  { %v282_v37 = vpop.eup %281  ;;  %v204_v38 = vmul.f32 %v280_v36, %v385_v8  ;;  %v205_v39 = vmul.f32 %v280_v36, %v387_v9 }
 0x16b   :  { %v202_v40 = vmul.f32 %v282_v37, %v373_v2  ;;  %v203_v41 = vmul.f32 %v282_v37, %v377_v4 }
 0x16c   :  { %220 = vst [vmem:[#allocation5 + $0x10] sm:$0xff] %v204_v38  ;;  %221 = vst [vmem:[#allocation5 + $0x18] sm:$0xff] %v205_v39 }
 0x16d   :  { %v284_v42 = vpop.eup %283  ;;  %218 = vst [vmem:[#allocation5] sm:$0xff] %v202_v40  ;;  %219 = vst [vmem:[#allocation5 + $0x8] sm:$0xff] %v203_v41 }
 0x16e   :  { %v286_v43 = vpop.eup %285  ;;  %v208_v44 = vmul.f32 %v284_v42, %v409_v20  ;;  %v209_v45 = vmul.f32 %v284_v42, %v411_v21 }
 0x16f   :  { %v206_v46 = vmul.f32 %v286_v43, %v397_v14  ;;  %v207_v8 = vmul.f32 %v286_v43, %v399_v15 }
 0x170   :  { %224 = vst [vmem:[#allocation5 + $0x30] sm:$0xff] %v208_v44  ;;  %225 = vst [vmem:[#allocation5 + $0x38] sm:$0xff] %v209_v45 }
 0x171   :  { %v288_v9 = vpop.eup %287  ;;  %222 = vst [vmem:[#allocation5 + $0x20] sm:$0xff] %v206_v46  ;;  %223 = vst [vmem:[#allocation5 + $0x28] sm:$0xff] %v207_v8 }
 0x172   :  { %v290_v2 = vpop.eup %289  ;;  %v212_v4 = vmul.f32 %v288_v9, %v379_v5  ;;  %v213_v47 = vmul.f32 %v288_v9, %v381_v6 }
 0x173   :  { %v210_v48 = vmul.f32 %v290_v2, %v369_v0  ;;  %v211_v20 = vmul.f32 %v290_v2, %v371_v1 }
 0x174   :  { %228 = vst [vmem:[#allocation5 + $0x50] sm:$0xff] %v212_v4  ;;  %229 = vst [vmem:[#allocation5 + $0x58] sm:$0xff] %v213_v47 }
 0x175   :  { %v292_v14 = vpop.eup %291  ;;  %226 = vst [vmem:[#allocation5 + $0x40] sm:$0xff] %v210_v48  ;;  %227 = vst [vmem:[#allocation5 + $0x48] sm:$0xff] %v211_v20 }
 0x176   :  { %v294_v15 = vpop.eup %293  ;;  %v216_v21 = vmul.f32 %v292_v14, %v405_v18  ;;  %v217_v49 = vmul.f32 %v292_v14, %v407_v19 }
 0x177   :  { %v214_v5 = vmul.f32 %v294_v15, %v393_v12  ;;  %v215_v6 = vmul.f32 %v294_v15, %v395_v13 }
 0x178   :  { %232 = vst [vmem:[#allocation5 + $0x70] sm:$0xff] %v216_v21  ;;  %233 = vst [vmem:[#allocation5 + $0x78] sm:$0xff] %v217_v49 }
 0x179   :  { %230 = vst [vmem:[#allocation5 + $0x60] sm:$0xff] %v214_v5  ;;  %231 = vst [vmem:[#allocation5 + $0x68] sm:$0xff] %v215_v6 }
 0x17a   :  { %326 = shalt.err (!%p323_p9)
}
 0x17b   :  { %245 = dma.vmem_to_hbm [thread:$0]  %s240_s6, 2048, %s482_s3, [#allocation4], %s340_s15, %s340_s15, %s341_s16  }
 0x17c   :  { %337 = dma.done.wait [#allocation4], 2048  }
 0x17d   :  { %338 = vsyncadd [#allocation4], 4294965248 }
 0x17e   :  { %249 = vsyncpa [#allocation3], 1 }
 0x17f   :  { %250 = vsyncpa [#allocation4], 1 }

</bundles_post_ra>
